<compile_context>
chip_gen: v5e
topology: v5e:2x2
jax: 0.10.0
libtpu: 0.0.40
codegen_flags: <defaults>
</compile_context>

<pallas_src>
import functools

import jax
import jax.numpy as jnp
from jax.experimental import pallas as pl
from jax.experimental.pallas import tpu as pltpu


def _round_up(x: int, m: int) -> int:
    return (x + m - 1) // m * m


def _vmem_capacity_bytes() -> int:
    try:
        info = pltpu.get_tpu_info()
        cap = getattr(info, "vmem_capacity_bytes", None)
        if cap:
            return int(cap)
    except Exception:
        pass
    return 64 * 1024 * 1024  # conservative (v7x per-TC VMEM)


def _ce_partial_kernel(pred_ref, tgt_ref, out_ref, *, n_total, chunk):
    # pred_ref: (tile_n, C)            native-dtype logits in VMEM
    # tgt_ref:  (tile_n // chunk, chunk) int32 class indices (lane-dense) in VMEM
    # out_ref:  (1, 1, 128)            f32 partial-sum row in VMEM
    tile_n, c = pred_ref.shape
    chunks_per_tile = tile_n // chunk
    row_base = pl.program_id(0) * tile_n

    # Hoisted loop invariants (JAX does not CSE broadcast_in_dim inside loops).
    col_iota = jax.lax.broadcasted_iota(jnp.int32, (1, c), 1)              # (1, C)
    sub_iota = jax.lax.broadcasted_iota(jnp.int32, (chunk, 1), 0)          # (chunk, 1)
    # (chunk, chunk) f32 identity: moves the lane-arranged target chunk into
    # per-row (sublane) orientation with one tiny MXU matmul (no cross-lane
    # relayout / unsupported reshape needed).  Built once per grid step.
    eye = (jax.lax.broadcasted_iota(jnp.int32, (chunk, chunk), 0)
           == jax.lax.broadcasted_iota(jnp.int32, (chunk, chunk), 1)
           ).astype(jnp.float32)

    def chunk_body(ci, acc):
        r0 = pl.multiple_of(ci * chunk, chunk)
        p_nat = pred_ref[pl.ds(r0, chunk), :]                              # (chunk, C) native

        # Target chunk: (1, chunk) lanes  ->  (chunk, 1) sublanes via identity
        # matmul (class indices < 2^24, so the f32 round-trip is exact).
        t_row = tgt_ref[pl.ds(ci, 1), :].astype(jnp.float32)               # (1, chunk)
        t_col = jax.lax.dot_general(
            eye, t_row,
            dimension_numbers=(((1,), (1,)), ((), ())),
            preferred_element_type=jnp.float32,
        ).astype(jnp.int32)                                                # (chunk, 1)

        # Target-class logit via a one-hot select (no gather).  Exact in the
        # native dtype (only one non-zero per row), then widened to f32.
        onehot = col_iota == t_col                                         # (chunk, C)
        picked = jnp.sum(jnp.where(onehot, p_nat, 0),
                         axis=-1, keepdims=True).astype(jnp.float32)       # (chunk, 1)

        # Stable log-sum-exp: max in native dtype (exact), (p - m)/exp/sums in f32.
        m = jnp.max(p_nat, axis=-1, keepdims=True).astype(jnp.float32)     # (chunk, 1)
        e = jnp.exp(p_nat.astype(jnp.float32) - m)                         # (chunk, C) f32
        lse = jnp.log(jnp.sum(e, axis=-1, keepdims=True)) + m              # (chunk, 1)

        # Mask rows past the global N (remainder of the last tile).  This must
        # stay a true select (jnp.where), NOT a multiplicative mask: padded rows
        # may hold garbage whose lse is Inf/NaN.
        valid = (row_base + r0 + sub_iota) < n_total
        per_row = jnp.where(valid, lse - picked, 0.0)                      # (chunk, 1)
        return acc + jnp.sum(per_row)

    acc = jax.lax.fori_loop(0, chunks_per_tile, chunk_body,
                            jnp.zeros((1, 1), jnp.float32))

    # Lane-dense, unmasked (1, 1, 128) store: partial sum in lane 0, zeros elsewhere.
    lane = jax.lax.broadcasted_iota(jnp.int32, out_ref.shape, 2)
    out_ref[...] = jnp.where(lane == 0, acc[0, 0], 0.0)


def yolo_loss(predictions: jax.Array, target: jax.Array) -> jax.Array:
    """Equivalent of YoloLoss.forward = nn.CrossEntropyLoss()(predictions, target).

    predictions: (N, C) float logits (any float dtype; widened to f32 in-kernel).
    target:      (N,)   integer class indices.
    Returns a scalar float32 mean cross-entropy loss.
    """
    n, c = predictions.shape
    pred_row_bytes = max(1, c * predictions.dtype.itemsize)

    # Generation-aware VMEM budgets.
    vmem_cap = _vmem_capacity_bytes()
    if vmem_cap >= 96 * 1024 * 1024:       # v5e / v6e: 128 MiB physical VMEM
        per_buffer_budget = 8 * 1024 * 1024
        vmem_limit = 64 * 1024 * 1024
    else:                                  # v7x: 64 MiB physical VMEM
        per_buffer_budget = 4 * 1024 * 1024
        vmem_limit = 32 * 1024 * 1024

    base_chunk = 256                       # rows processed per inner-loop step
    rows_budget = max(8, per_buffer_budget // (pred_row_bytes + 4))

    if n <= min(rows_budget, 2048):
        # Single grid step.
        if n <= base_chunk:
            tile_n = _round_up(n, 8)
            chunk = tile_n
        else:
            chunk = base_chunk
            tile_n = _round_up(n, chunk)
        num_tiles = 1
    else:
        chunk = base_chunk
        unit = 8 * chunk                   # keeps the target block's 2nd-minor % 8 == 0
        if rows_budget < unit:
            # Very large C: shrink the row chunk so an (8*chunk)-row tile fits.
            chunk = max(8, (rows_budget // 8) // 8 * 8)
            unit = 8 * chunk
        tile_n = max(unit, rows_budget // unit * unit)
        # Ensure >= 2 grid steps so the "parallel" axis can use both v7x cores.
        tile_n = min(tile_n, max(unit, _round_up(pl.cdiv(n, 2), unit)))
        num_tiles = pl.cdiv(n, tile_n)

    # Headroom guard for unusually large C (double-buffered input + in-kernel
    # f32 intermediates must fit the scoped-VMEM limit).
    est = (2 * tile_n * (pred_row_bytes + 4)
           + 6 * chunk * c * 4 + chunk * chunk * 4 + (2 << 20))
    vmem_limit = max(vmem_limit, min(est, (vmem_cap * 7) // 8))

    # Lane-dense target layout: (ceil(N/chunk), chunk) int32 -> contiguous DMA,
    # no (N, 1) 128-lane padding in HBM or VMEM.
    n_rows_t = pl.cdiv(n, chunk)
    tgt = target.astype(jnp.int32).reshape(-1)
    tgt = jnp.pad(tgt, (0, n_rows_t * chunk - n))
    tgt2d = tgt.reshape(n_rows_t, chunk)

    cost = pl.CostEstimate(
        flops=8 * n * c + 2 * n * chunk,
        transcendentals=n * c + n,
        bytes_accessed=n * c * predictions.dtype.itemsize + n * 4 + num_tiles * 512,
    )

    partials = pl.pallas_call(
        functools.partial(_ce_partial_kernel, n_total=n, chunk=chunk),
        out_shape=jax.ShapeDtypeStruct((num_tiles, 1, 128), jnp.float32),
        grid_spec=pltpu.PrefetchScalarGridSpec(
            num_scalar_prefetch=0,
            grid=(num_tiles,),
            in_specs=[
                pl.BlockSpec((tile_n, c), lambda i: (i, 0)),
                pl.BlockSpec((tile_n // chunk, chunk), lambda i: (i, 0)),
            ],
            out_specs=pl.BlockSpec((1, 1, 128), lambda i: (i, 0, 0)),
        ),
        compiler_params=pltpu.CompilerParams(
            dimension_semantics=("parallel",),
            vmem_limit_bytes=vmem_limit,
        ),
        cost_estimate=cost,
    )(predictions, tgt2d)

    # Tiny final reduction: sum of per-tile partials, divide by the GLOBAL N.
    return jnp.sum(partials) / jnp.float32(n)


if __name__ == "__main__":
    # Small shapes consistent with the module: a batch of 8 logit rows, 16 classes.
    key = jax.random.PRNGKey(0)
    k_pred, k_tgt = jax.random.split(key)
    N, C = 8, 16
    predictions = jax.random.normal(k_pred, (N, C), dtype=jnp.float32)
    target = jax.random.randint(k_tgt, (N,), 0, C, dtype=jnp.int32)

    loss = yolo_loss(predictions, target)
    jax.block_until_ready(loss)
    logp = jax.nn.log_softmax(predictions, axis=-1)
    ref = -jnp.mean(logp[jnp.arange(N), target])
    assert jnp.allclose(loss, ref, atol=1e-5, rtol=1e-5), (loss, ref)

    # Single-tile / multi-chunk / non-divisible / bf16 path.
    k2p, k2t = jax.random.split(jax.random.PRNGKey(1))
    N2, C2 = 2000, 64
    p2 = jax.random.normal(k2p, (N2, C2), dtype=jnp.bfloat16)
    t2 = jax.random.randint(k2t, (N2,), 0, C2, dtype=jnp.int32)
    loss2 = yolo_loss(p2, t2)
    jax.block_until_ready(loss2)
    logp2 = jax.nn.log_softmax(p2.astype(jnp.float32), axis=-1)
    ref2 = -jnp.mean(logp2[jnp.arange(N2), t2])
    assert jnp.allclose(loss2, ref2, atol=2e-3, rtol=2e-3), (loss2, ref2)

    # Multi-tile (grid) path with a non-divisible row count and non-128 C.
    k3p, k3t = jax.random.split(jax.random.PRNGKey(2))
    N3, C3 = 5000, 48
    p3 = jax.random.normal(k3p, (N3, C3), dtype=jnp.float32)
    t3 = jax.random.randint(k3t, (N3,), 0, C3, dtype=jnp.int32)
    loss3 = yolo_loss(p3, t3)
    jax.block_until_ready(loss3)
    logp3 = jax.nn.log_softmax(p3, axis=-1)
    ref3 = -jnp.mean(logp3[jnp.arange(N3), t3])
    assert jnp.allclose(loss3, ref3, atol=1e-4, rtol=1e-4), (loss3, ref3)

    print("KERNEL_OK")
</pallas_src>

<mosaic_0001>
module attributes {stable_mosaic.version = 11 : i64} {
  func.func @_ce_partial_kernel(%arg0: i32, %arg1: memref<8x16xf32, #tpu.memory_space<vmem>>, %arg2: memref<1x8xi32, #tpu.memory_space<vmem>>, %arg3: memref<1x1x128xf32, #tpu.memory_space<vmem>>) attributes {dimension_semantics = [#tpu.dimension_semantics<parallel>], iteration_bounds = array<i64: 1>, scalar_prefetch = 0 : i64, scratch_operands = 0 : i64, tpu.core_type = #tpu.core_type<tc>, window_params = [{transform_indices = @transform_0, window_bounds = array<i64: 8, 16>}, {transform_indices = @transform_1, window_bounds = array<i64: 1, 8>}, {transform_indices = @transform_2, window_bounds = array<i64: 1, 1, 128>}]} {
    %c8_i32 = arith.constant 8 : i32
    %0 = arith.muli %arg0, %c8_i32 : i32
    %1 = tpu.iota {dimensions = array<i32: 1>} : vector<1x16xi32>
    %2 = tpu.iota {dimensions = array<i32: 0>} : vector<8x1xi32>
    %3 = tpu.iota {dimensions = array<i32: 0>} : vector<8x8xi32>
    %4 = tpu.iota {dimensions = array<i32: 1>} : vector<8x8xi32>
    %5 = arith.cmpi eq, %3, %4 : vector<8x8xi32>
    %6 = arith.extui %5 : vector<8x8xi1> to vector<8x8xi32>
    %7 = arith.sitofp %6 : vector<8x8xi32> to vector<8x8xf32>
    %cst = arith.constant 0.000000e+00 : f32
    %8 = vector.broadcast %cst : f32 to vector<1x1xf32>
    %c0_i32 = arith.constant 0 : i32
    %c8_i32_0 = arith.constant 8 : i32
    %9 = arith.muli %c0_i32, %c8_i32_0 : i32
    %10 = tpu.assume_multiple %9, 8 : i32
    %11 = arith.index_cast %10 : i32 to index
    %c0 = arith.constant 0 : index
    %12 = vector.load %arg1[%11, %c0] : memref<8x16xf32, #tpu.memory_space<vmem>>, vector<8x16xf32>
    %13 = arith.index_cast %c0_i32 : i32 to index
    %c0_1 = arith.constant 0 : index
    %14 = vector.load %arg2[%13, %c0_1] : memref<1x8xi32, #tpu.memory_space<vmem>>, vector<1x8xi32>
    %15 = arith.sitofp %14 : vector<1x8xi32> to vector<1x8xf32>
    %cst_2 = arith.constant dense<0.000000e+00> : vector<8x1xf32>
    %16 = tpu.matmul %7, %15, %cst_2 {dimension_numbers = #tpu.dot_dimension_numbers<[1], [1], [0], [0], [0, 0, 1, 0], [], []>} : vector<8x8xf32>, vector<1x8xf32>, vector<8x1xf32> -> vector<8x1xf32>
    %17 = arith.fptosi %16 : vector<8x1xf32> to vector<8x1xi32>
    %18 = vector.broadcast %1 : vector<1x16xi32> to vector<8x16xi32>
    %19 = vector.broadcast %17 : vector<8x1xi32> to vector<8x16xi32>
    %20 = arith.cmpi eq, %18, %19 : vector<8x16xi32>
    %c0_i32_3 = arith.constant 0 : i32
    %21 = arith.sitofp %c0_i32_3 : i32 to f32
    %22 = vector.broadcast %21 : f32 to vector<8x16xf32>
    %23 = arith.select %20, %12, %22 : vector<8x16xi1>, vector<8x16xf32>
    %cst_4 = arith.constant dense<0.000000e+00> : vector<8xf32>
    %24 = vector.multi_reduction <add>, %23, %cst_4 [1] : vector<8x16xf32> to vector<8xf32>
    %25 = vector.shape_cast %24 : vector<8xf32> to vector<8x1xf32>
    %cst_5 = arith.constant dense<0xFF800000> : vector<8xf32>
    %26 = vector.multi_reduction <maximumf>, %12, %cst_5 [1] : vector<8x16xf32> to vector<8xf32>
    %27 = vector.shape_cast %26 : vector<8xf32> to vector<8x1xf32>
    %28 = vector.broadcast %27 : vector<8x1xf32> to vector<8x16xf32>
    %29 = arith.subf %12, %28 : vector<8x16xf32>
    %30 = math.exp %29 : vector<8x16xf32>
    %cst_6 = arith.constant dense<0.000000e+00> : vector<8xf32>
    %31 = vector.multi_reduction <add>, %30, %cst_6 [1] : vector<8x16xf32> to vector<8xf32>
    %32 = vector.shape_cast %31 : vector<8xf32> to vector<8x1xf32>
    %33 = math.log %32 : vector<8x1xf32>
    %34 = arith.addf %33, %27 : vector<8x1xf32>
    %35 = arith.addi %0, %10 : i32
    %36 = vector.broadcast %35 : i32 to vector<8x1xi32>
    %37 = arith.addi %36, %2 : vector<8x1xi32>
    %c8_i32_7 = arith.constant 8 : i32
    %38 = vector.broadcast %c8_i32_7 : i32 to vector<8x1xi32>
    %39 = arith.cmpi slt, %37, %38 : vector<8x1xi32>
    %40 = arith.subf %34, %25 : vector<8x1xf32>
    %cst_8 = arith.constant 0.000000e+00 : f32
    %41 = vector.broadcast %cst_8 : f32 to vector<8x1xf32>
    %42 = arith.select %39, %40, %41 : vector<8x1xi1>, vector<8x1xf32>
    %43 = vector.shape_cast %42 : vector<8x1xf32> to vector<1x8x1xf32>
    %cst_9 = arith.constant dense<0.000000e+00> : vector<1xf32>
    %44 = vector.multi_reduction <add>, %43, %cst_9 [1, 2] : vector<1x8x1xf32> to vector<1xf32>
    %45 = vector.shape_cast %44 : vector<1xf32> to vector<1x1x1xf32>
    %46 = vector.extract %45[0, 0, 0] : f32 from vector<1x1x1xf32>
    %47 = vector.broadcast %46 : f32 to vector<1x1xf32>
    %48 = arith.addf %8, %47 : vector<1x1xf32>
    %c1_i32 = arith.constant 1 : i32
    %49 = tpu.iota {dimensions = array<i32: 2>} : vector<1x1x128xi32>
    %c0_i32_10 = arith.constant 0 : i32
    %50 = vector.broadcast %c0_i32_10 : i32 to vector<1x1x128xi32>
    %51 = arith.cmpi eq, %49, %50 : vector<1x1x128xi32>
    %52 = vector.extract %48[0, 0] : f32 from vector<1x1xf32>
    %cst_11 = arith.constant 0.000000e+00 : f32
    %53 = vector.broadcast %52 : f32 to vector<1x1x128xf32>
    %54 = vector.broadcast %cst_11 : f32 to vector<1x1x128xf32>
    %55 = arith.select %51, %53, %54 : vector<1x1x128xi1>, vector<1x1x128xf32>
    %c0_12 = arith.constant 0 : index
    %c0_13 = arith.constant 0 : index
    %c0_14 = arith.constant 0 : index
    %56 = vector.load %arg3[%c0_12, %c0_13, %c0_14] : memref<1x1x128xf32, #tpu.memory_space<vmem>>, vector<1x1x128xf32>
    tpu.vector_store %arg3[%c0_12, %c0_13, %c0_14], %55 {strides = array<i32>} : memref<1x1x128xf32, #tpu.memory_space<vmem>>, vector<1x1x128xf32>,
    return
  }
  func.func @transform_0(%arg0: i32) -> (i32, i32) {
    %c0_i32 = arith.constant 0 : i32
    %c0_i32_0 = arith.constant 0 : i32
    return %arg0, %c0_i32 : i32, i32
  }
  func.func @transform_1(%arg0: i32) -> (i32, i32) {
    %c0_i32 = arith.constant 0 : i32
    %c0_i32_0 = arith.constant 0 : i32
    return %arg0, %c0_i32 : i32, i32
  }
  func.func @transform_2(%arg0: i32) -> (i32, i32, i32) {
    %c0_i32 = arith.constant 0 : i32
    %c0_i32_0 = arith.constant 0 : i32
    %c0_i32_1 = arith.constant 0 : i32
    return %arg0, %c0_i32, %c0_i32_0 : i32, i32, i32
  }
}

</mosaic_0001>

<bundles_post_ra>
// kernel: tpu_custom_call.1
= control target key start
LH: loop header
LB: loop body
LE: loop exit
PB: predicated region body
PF: predicated region fallthrough
CT: control target
= control target key end

     0   :  { %7 = vsyncpa [#allocation3], 0  ;;  %s245_s0 = inlined_call_operand.hbm [shape: f32[8,16], index: 0, kind: input, shape index: {}]   ;;  %s246_s1 = inlined_call_operand.hbm [shape: s32[1,8], index: 1, kind: input, shape index: {}]   ;;  %s247_s2 = inlined_call_operand.hbm [shape: f32[1,1,128], index: 2, kind: output, shape index: {}]  }
   0x1   :  { %8 = vsyncpa [#allocation6], 0 }
   0x2   :  { %9 = vsyncpa [#allocation4], 0  ;;  %s15_s11 = sshll.u32 %s245_s0, 4  ;;  %s214_s12 = smov [#allocation2]   ;;  %s16_s11 = int_to_ptr.hbm [resolvable:$true] %s15_s11 }
   0x3   :  { %s17_s13 = sshll.u32 %s214_s12, 4  ;;  %s26_s16 = sshll.u32 %s246_s1, 4  ;;  %s18_s13 = int_to_ptr.vmem [resolvable:$true] %s17_s13  ;;  %s27_s16 = int_to_ptr.hbm [resolvable:$true] %s26_s16 }
   0x4   :  { %20 = dma.hbm_to_vmem [thread:$0]  %s16_s11, 128, %s18_s13, [#allocation3]  }
   0x5   :  { %s215_s17 = smov [#allocation5]  }
   0x6   :  { %s28_s18 = sshll.u32 %s215_s17, 4  ;;  %s29_s18 = int_to_ptr.vmem [resolvable:$true] %s28_s18 }
   0x7   :  { %31 = dma.hbm_to_vmem [thread:$0]  %s27_s16, 16, %s29_s18, [#allocation6]  }
   0x8   :  { %208 = dma.done.wait [#allocation3], 128  }
   0x9   :  { %209 = vsyncadd [#allocation3], 4294967168 }
   0xa   :  { %210 = dma.done.wait [#allocation6], 16  }
   0xb   :  { %211 = vsyncadd [#allocation6], 4294967280  ;;  %v41_v0 = vlaneseq  ;;  %vm62_vm0 = vcmask 130048   ;;  %v48_v3 = vld [vmem:[#allocation2] sm:$0xff]  ;;  %v49_v4 = vld [vmem:[#allocation5] sm:$0x1] }
   0xc   :  { %v66_v5 = vsel %vm62_vm0, %v48_v3, -inf  ;;  %v50_v6 = vcvt.s32.f32 %v49_v4  ;;  %v216_v7 = vmov 0.0   ;;  %vm55_vm2 = vcmask 64512   ;;  %s217_s0 = smov [#allocation7]   ;;  %s109_s21 = sshll.u32 %s247_s2, 4  ;;  %s110_s21 = int_to_ptr.hbm [resolvable:$true] %s109_s21 }
   0xd   :  { %v42_v1 = vand.u32 127, %v41_v0  ;;  %v44_v2 = vshrl.u32 %v41_v0, 7  ;;  %67 = vmax.xlane.f32.xlu0 %v66_v5  ;;  %vm84_vm5 = vcmask 7168   ;;  %s107_s1 = sshll.u32 %s217_s0, 4  ;;  %s108_s1 = int_to_ptr.vmem [resolvable:$true] %s107_s1 }
   0xe   :  { %v52_v9 = vperm.slane %v50_v6, 0 }
   0xf   :  { %vm45_vm1 = vcmp.eq.s32.totalorder %v44_v2, %v42_v1  ;;  %vm97_vm6 = vcmp.eq.s32.totalorder %v42_v1, 0 }
  0x10   :  { %v120_v8 = vsel %vm45_vm1, 1.0, %v216_v7 }
  0x11   :  { %v54_v10 = vmul.f32 %v120_v8, %v52_v9 }
  0x13   :  { %v56_v11 = vsel %vm55_vm2, %v54_v10, 0.0 }
  0x15   :  { %57 = vadd.xlane.f32.xlu0 %v56_v11 }
  0x80   :  { %v68_v12 = vpop.xlane.xlu0 %67 }
  0x81   :  { %v69_v13 = vsub.f32 %v48_v3, %v68_v12 }
  0x83   :  { %v70_v14 = vmul.f32 1.442695, %v69_v13 }
  0x85   :  { %132 = vpow2.f32 %v70_v14 }
  0x88   :  { %v58_v15 = vpop.xlane.xlu0 %57 }
  0x89   :  { %vm121_vm3 = vcmp.lt.s32.totalorder %v58_v15, 0  ;;  %v122_v16 = vceil.f32 %v58_v15  ;;  %v123_v17 = vfloor.f32 %v58_v15 }
  0x8b   :  { %v133_v18 = vpop.eup %132  ;;  %v124_v19 = vsel %vm121_vm3, %v122_v16, %v123_v17 }
  0x8c   :  { %v72_v20 = vsel %vm62_vm0, %v133_v18, 0.0  ;;  %v125_v21 = vcvt.f32.s32 %v124_v19 }
  0x8d   :  { %73 = vadd.xlane.f32.xlu1 %v72_v20 }
  0x8e   :  { %vm60_vm4 = vcmp.eq.s32.totalorder %v42_v1, %v125_v21 }
  0x8f   :  { %v61_v22 = vsel %vm60_vm4, %v48_v3, 0.0 }
  0x90   :  { %v63_v23 = vsel %vm62_vm0, %v61_v22, 0.0 }
  0x95   :  { %64 = vadd.xlane.f32.xlu1 %v63_v23 }
 0x100   :  { %v74_v24 = vpop.xlane.xlu1 %73 }
 0x101   :  { %134 = vlog2.f32 %v74_v24 }
 0x107   :  { %v135_v25 = vpop.eup %134 }
 0x108   :  { %v76_v26 = vmul.f32 0.6931472, %v135_v25  ;;  %v65_v27 = vpop.xlane.xlu1 %64 }
 0x10a   :  { %v77_v28 = vadd.f32 %v76_v26, %v68_v12 }
 0x10c   :  { %v82_v29 = vsub.f32 %v77_v28, %v65_v27 }
 0x10e   :  { %v85_v30 = vsel %vm84_vm5, %v82_v29, 0.0 }
 0x10f   :  { %86 = vadd.xlane.f32.xlu2 %v85_v30 }
 0x182   :  { %v87_v31 = vpop.xlane.xlu2 %86 }
 0x183   :  { %v88_v32 = vrot.slane %v87_v31, 4 }
 0x185   :  { %v89_v33 = vadd.f32 %v88_v32, %v87_v31 }
 0x187   :  { %v90_v34 = vrot.slane %v89_v33, 2 }
 0x189   :  { %v91_v35 = vadd.f32 %v90_v34, %v89_v33 }
 0x18b   :  { %v92_v36 = vrot.slane %v91_v35, 1 }
 0x18d   :  { %v93_v37 = vadd.f32 %v92_v36, %v91_v35 }
 0x18f   :  { %126 = vpush %v93_v37 }
 0x1c0   :  { %s127_s22 = spop %126 }
 0x1c1   :  { %v99_v38 = vstv %s127_s22 }
 0x1c2   :  { %v100_v39 = vsel %vm97_vm6, %v99_v38, 0.0 }
 0x1c3   :  { %101 = vst [vmem:[#allocation7] sm:$0x1] %v100_v39 }
 0x1c4   :  { %112 = dma.vmem_to_hbm [thread:$0]  %s108_s1, 16, %s110_s21, [#allocation4]  }
 0x1c5   :  { %212 = dma.done.wait [#allocation4], 16  }
 0x1c6   :  { %213 = vsyncadd [#allocation4], 4294967280 }
 0x1c7   :  { %117 = vsyncpa [#allocation3], 1 }
 0x1c8   :  { %118 = vsyncpa [#allocation6], 1 }
 0x1c9   :  { %119 = vsyncpa [#allocation4], 1 }

</bundles_post_ra>
